<compile_context>
chip_gen: v7x
topology: tpu7x:2x2x1
jax: 0.10.0
libtpu: 0.0.40
codegen_flags: <defaults>
</compile_context>

<pallas_src>
import functools

import jax
import jax.numpy as jnp
from jax.experimental import pallas as pl
from jax.experimental.pallas import tpu as pltpu


def _leaky(x, alpha):
    return jnp.where(x >= 0, x, alpha * x)


# ----------------------------------------------------------------------------
# One full embedding-propagation layer, tiled over output node rows.
# ----------------------------------------------------------------------------
def _layer_kernel(alpha, dp, tile, adj_ref, e_ref, w_ref, out_ref):
    """Per-tile layer update.

    adj_ref : (2*tile, Np) bf16   pre-normalized rows, stacked [normA.T tile ; normA tile]
    e_ref   : (Np, 2*Dp)   bf16   concat([user, item], -1), grid-invariant / single-buffered
    w_ref   : (4*Dp, 2*Dp) bf16   block-diag([[W1;W2], 0], [0, [W1;W2]]), single-buffered
    out_ref : (tile, 2*Dp) bf16   concat([new_user, new_item], -1), lane-dense
    """
    f32 = jnp.float32
    row0 = pl.multiple_of(pl.program_id(0) * tile, tile)

    # Single fused N-contraction: one (2*tile, N) @ (N, 2Dp) bf16 MXU dot (f32 accumulation)
    # yields both the user-update aggregates (normA.T @ [user|item]) and the item-update
    # aggregates (normA @ [user|item]).
    p = jnp.dot(adj_ref[...], e_ref[...], preferred_element_type=f32)   # (2*tile, 2Dp)
    p_u = p[:tile, :]      # normA.T @ [user | item]
    p_i = p[tile:, :]      # normA   @ [user | item]

    # This tile's own embeddings, sliced from the resident buffer (no extra DMA).
    e_t = e_ref[pl.ds(row0, tile), :]                                   # (tile, 2Dp) bf16
    u_t = e_t[:, :dp].astype(f32)
    i_t = e_t[:, dp:].astype(f32)

    # Fused D-contraction: one bf16 (tile, 4Dp) @ (4Dp, 2Dp) dot against the block-diagonal
    # stacked weights gives [W1-term+W2-term | W1-term+W2-term] for user/item directly.
    lhs = jnp.concatenate(
        [p_u[:, dp:],            # (normA.T @ item)           -> W1
         i_t * p_u[:, :dp],      # item * (normA.T @ user)    -> W2
         p_i[:, :dp],            # (normA @ user)             -> W1
         u_t * p_i[:, dp:]],     # user * (normA @ item)      -> W2
        axis=-1).astype(jnp.bfloat16)                                   # (tile, 4Dp)
    prop = jnp.dot(lhs, w_ref[...], preferred_element_type=f32)         # (tile, 2Dp)

    out_ref[...] = _leaky(prop + e_t.astype(f32), alpha).astype(out_ref.dtype)


# ----------------------------------------------------------------------------
# Generation-aware sizing helpers.
# ----------------------------------------------------------------------------
def _vmem_capacity_bytes():
    # 128 MiB on v5e/v6e, 64 MiB per TensorCore on v7x.
    try:
        return int(pltpu.get_tpu_info().vmem_capacity_bytes)
    except Exception:
        return 64 << 20          # conservative fallback (v7x per-core size)


def _num_tensorcores():
    try:
        kind = jax.devices()[0].device_kind.lower()
        if "v7" in kind:
            return 2             # megacore-style: 2 TensorCores per chip
    except Exception:
        pass
    return 1                     # v5e / v6e: single TensorCore


def _pick_tile(n, dp, *, vmem_budget_bytes, cap=1024, min_grid_steps=1):
    """Largest row tile that (a) divides n, (b) is a multiple of 16 (bf16 sublane packing),
    (c) keeps pipelined streams + resident blocks + in-kernel temporaries under the VMEM
    budget, and (d) leaves >= min_grid_steps grid steps (megacore sharding on 2-core parts)."""
    two_dp = 2 * dp
    # Resident single-buffered blocks: embeddings (N, 2Dp) bf16 + block-diag weights.
    resident = n * two_dp * 2 + (4 * dp) * two_dp * 2
    budget = max(vmem_budget_bytes - resident, 1 << 20)
    per_tile_row = (
        2 * (2 * n * 2)          # double-buffered stacked adjacency stream: 2 bf16 rows of N
        + 2 * (two_dp * 2)       # double-buffered bf16 output row
        + 64 * dp                # in-kernel temporaries (f32 p / lhs / out, bf16 lhs)
    )
    limit = min(n, cap, max(16, budget // per_tile_row))
    tile = None
    for t in range(16, int(limit) + 1, 16):
        if n % t == 0:
            tile = t
    if tile is None:
        tile = n                 # tiny / odd n: full-extent block is always a legal shape
    # Only halve for >= min_grid_steps when there are multiple TensorCores to feed.
    while min_grid_steps > 1 and n // tile < min_grid_steps and tile % 32 == 0:
        tile //= 2
    return tile


# ----------------------------------------------------------------------------
# pallas_call wrapper for one layer.
# ----------------------------------------------------------------------------
def propagation_layer(e, adj_stack, w_blk, *, alpha, dp, tile, vmem_limit_bytes):
    n, two_dp = e.shape
    assert n % tile == 0
    kern = functools.partial(_layer_kernel, alpha, dp, tile)
    return pl.pallas_call(
        kern,
        grid=(n // tile,),
        in_specs=[
            # stacked [normA.T ; normA] row tile for this output tile (bf16 stream)
            pl.BlockSpec((2 * tile, n), lambda i: (i, 0)),
            # resident concat([user, item]) embeddings: grid-invariant, single-buffered
            pl.BlockSpec((n, two_dp), lambda i: (0, 0), pipeline_mode=pl.Buffered(1)),
            # resident block-diagonal stacked weights: grid-invariant, single-buffered
            pl.BlockSpec((2 * two_dp, two_dp), lambda i: (0, 0), pipeline_mode=pl.Buffered(1)),
        ],
        out_specs=pl.BlockSpec((tile, two_dp), lambda i: (i, 0)),
        out_shape=jax.ShapeDtypeStruct((n, two_dp), jnp.bfloat16),
        compiler_params=pltpu.CompilerParams(
            dimension_semantics=("parallel",),
            vmem_limit_bytes=vmem_limit_bytes,
        ),
    )(adj_stack, e, w_blk)


# ----------------------------------------------------------------------------
# Multi-layer wrapper (GraphEmbeddingPropagation.forward).
# ----------------------------------------------------------------------------
def graph_embedding_propagation(user0, item0, adjacency, batch_nodes, layer_weights,
                                *, alpha=0.2, tile=None):
    n_u, n_i = adjacency.shape
    assert n_u == n_i, "reference broadcasting requires num_users == num_items"
    n = n_u
    d = user0.shape[1]

    # Sampled adjacency: rows outside batch_nodes are dropped (dense zeros).
    row_mask = jnp.zeros((n, 1), jnp.float32).at[batch_nodes].set(1.0)
    sampled_adj = adjacency.astype(jnp.float32) * row_mask

    # ---- one-time, layer-invariant prep in plain JAX -------------------------------------
    # Symmetric sqrt-degree normalization precomputed ONCE (no per-step in-kernel divides).
    rs = sampled_adj.sum(axis=1, keepdims=True)
    cs = sampled_adj.sum(axis=0, keepdims=True)
    norm_adj = sampled_adj / (jnp.sqrt(rs * cs) + 1e-8)

    # Pad D so the output last dim (2*Dp) is a lane-dense multiple of 128, and pad N to a
    # multiple of 16. Zero padding is exact: padded rows/cols have zero degree and zero
    # embeddings, so they stay exactly zero through every layer.
    dp = ((d + 63) // 64) * 64
    n_pad = ((n + 15) // 16) * 16
    norm_adj = jnp.pad(norm_adj, ((0, n_pad - n), (0, n_pad - n)))
    u0 = jnp.pad(user0.astype(jnp.float32), ((0, n_pad - n), (0, dp - d)))
    i0 = jnp.pad(item0.astype(jnp.float32), ((0, n_pad - n), (0, dp - d)))
    e = jnp.concatenate([u0, i0], axis=1).astype(jnp.bfloat16)           # (Np, 2Dp)

    cap_bytes = _vmem_capacity_bytes()
    vmem_limit = int(cap_bytes * 0.75)           # leave headroom for compiler scratch
    if tile is None:
        tile = _pick_tile(n_pad, dp,
                          vmem_budget_bytes=int(cap_bytes * 0.6),
                          min_grid_steps=2 if _num_tensorcores() > 1 else 1)
    assert n_pad % tile == 0 and tile % 16 == 0

    # Stack normA.T and normA row tiles per output tile so the kernel can do a single
    # (2*tile, N) @ (N, 2Dp) dot. bf16 is the storage precision of the adjacency stream.
    n_steps = n_pad // tile
    norm_adj_bf = norm_adj.astype(jnp.bfloat16)
    adj_stack = jnp.concatenate(
        [norm_adj_bf.T.reshape(n_steps, tile, n_pad),
         norm_adj_bf.reshape(n_steps, tile, n_pad)],
        axis=1).reshape(2 * n_pad, n_pad)                                # (2Np, Np) bf16

    for (w1, w2) in layer_weights:
        w1p = jnp.zeros((dp, dp), jnp.float32).at[:d, :d].set(w1)
        w2p = jnp.zeros((dp, dp), jnp.float32).at[:d, :d].set(w2)
        w12 = jnp.concatenate([w1p, w2p], axis=0)                        # (2Dp, Dp)
        z = jnp.zeros_like(w12)
        w_blk = jnp.concatenate(
            [jnp.concatenate([w12, z], axis=1),
             jnp.concatenate([z, w12], axis=1)], axis=0).astype(jnp.bfloat16)   # (4Dp, 2Dp)
        e = propagation_layer(e, adj_stack, w_blk, alpha=alpha, dp=dp, tile=tile,
                              vmem_limit_bytes=vmem_limit)

    user_out = e[:n, :d].astype(jnp.float32)
    item_out = e[:n, dp:dp + d].astype(jnp.float32)
    return user_out, item_out, sampled_adj


# ----------------------------------------------------------------------------
# Pure-JAX reference for validation. Mirrors the kernel pipeline's storage precision
# (bf16 normA / embeddings / weights / second-contraction LHS, f32 accumulation).
# ----------------------------------------------------------------------------
def ref_forward(user0, item0, sampled_adj, layer_weights, alpha):
    f32, bf16 = jnp.float32, jnp.bfloat16
    d = user0.shape[1]
    rs = sampled_adj.sum(axis=1, keepdims=True)
    cs = sampled_adj.sum(axis=0, keepdims=True)
    na = (sampled_adj / (jnp.sqrt(rs * cs) + 1e-8)).astype(bf16)
    na_t = na.T
    u = user0.astype(bf16)
    it = item0.astype(bf16)
    for (w1, w2) in layer_weights:
        w12 = jnp.concatenate([w1, w2], axis=0).astype(bf16)             # (2D, D)
        ecat = jnp.concatenate([u, it], axis=1)                          # (N, 2D) bf16
        pu = jnp.dot(na_t, ecat, preferred_element_type=f32)
        pi = jnp.dot(na, ecat, preferred_element_type=f32)
        u32, i32 = u.astype(f32), it.astype(f32)
        lhs_u = jnp.concatenate([pu[:, d:], i32 * pu[:, :d]], axis=1).astype(bf16)
        lhs_i = jnp.concatenate([pi[:, :d], u32 * pi[:, d:]], axis=1).astype(bf16)
        new_u = _leaky(jnp.dot(lhs_u, w12, preferred_element_type=f32) + u32, alpha)
        new_i = _leaky(jnp.dot(lhs_i, w12, preferred_element_type=f32) + i32, alpha)
        u, it = new_u.astype(bf16), new_i.astype(bf16)
    return u.astype(f32), it.astype(f32)


if __name__ == "__main__":
    N, D, NUM_LAYERS, ALPHA = 64, 32, 3, 0.2

    key = jax.random.PRNGKey(0)
    k_adj, k_u, k_i, k_w = jax.random.split(key, 4)

    adjacency = (jax.random.uniform(k_adj, (N, N)) < 0.15).astype(jnp.float32)
    user0 = jax.random.normal(k_u, (N, D), dtype=jnp.float32)
    item0 = jax.random.normal(k_i, (N, D), dtype=jnp.float32)

    wkeys = jax.random.split(k_w, 2 * NUM_LAYERS)
    layer_weights = [
        (jax.random.normal(wkeys[2 * l], (D, D), dtype=jnp.float32),
         jax.random.normal(wkeys[2 * l + 1], (D, D), dtype=jnp.float32))
        for l in range(NUM_LAYERS)
    ]

    batch_nodes = jnp.array([0, 3, 5, 7, 11, 13, 17, 19, 23, 29, 31, 37, 41, 43, 47, 53],
                            dtype=jnp.int32)

    user_out, item_out, sampled_adj = graph_embedding_propagation(
        user0, item0, adjacency, batch_nodes, layer_weights, alpha=ALPHA)
    jax.block_until_ready((user_out, item_out))

    # Validate against the matched-precision JAX reference (same bf16 storage points,
    # same f32-accumulated MXU dots); tolerance covers accumulation-order differences.
    ref_u, ref_i = ref_forward(user0, item0, sampled_adj, layer_weights, ALPHA)
    assert jnp.allclose(user_out, ref_u, rtol=2e-2, atol=2e-2), "user embeddings mismatch"
    assert jnp.allclose(item_out, ref_i, rtol=2e-2, atol=2e-2), "item embeddings mismatch"

    print("KERNEL_OK")
</pallas_src>

<mosaic_0001>
module attributes {stable_mosaic.version = 11 : i64} {
  func.func @_layer_kernel(%arg0: i32, %arg1: memref<128x64xbf16, #tpu.memory_space<vmem>>, %arg2: memref<64x128xbf16, #tpu.memory_space<vmem>>, %arg3: memref<256x128xbf16, #tpu.memory_space<vmem>>, %arg4: memref<64x128xbf16, #tpu.memory_space<vmem>>) attributes {dimension_semantics = [#tpu.dimension_semantics<parallel>], iteration_bounds = array<i64: 1>, scalar_prefetch = 0 : i64, scratch_operands = 0 : i64, tpu.core_type = #tpu.core_type<tc>, window_params = [{transform_indices = @transform_0, window_bounds = array<i64: 128, 64>}, {pipeline_mode = #tpu.pipeline_mode<synchronous>, transform_indices = @transform_1, window_bounds = array<i64: 64, 128>}, {pipeline_mode = #tpu.pipeline_mode<synchronous>, transform_indices = @transform_2, window_bounds = array<i64: 256, 128>}, {transform_indices = @transform_3, window_bounds = array<i64: 64, 128>}]} {
    %c64_i32 = arith.constant 64 : i32
    %0 = arith.muli %arg0, %c64_i32 : i32
    %1 = tpu.assume_multiple %0, 64 : i32
    %c0 = arith.constant 0 : index
    %c0_0 = arith.constant 0 : index
    %2 = vector.load %arg1[%c0, %c0_0] : memref<128x64xbf16, #tpu.memory_space<vmem>>, vector<128x64xbf16>
    %c0_1 = arith.constant 0 : index
    %c0_2 = arith.constant 0 : index
    %3 = vector.load %arg2[%c0_1, %c0_2] : memref<64x128xbf16, #tpu.memory_space<vmem>>, vector<64x128xbf16>
    %cst = arith.constant dense<0.000000e+00> : vector<128x128xf32>
    %4 = tpu.matmul %2, %3, %cst {dimension_numbers = #tpu.dot_dimension_numbers<[1], [0], [0], [1], [0, 0, 1, 1], [], []>} : vector<128x64xbf16>, vector<64x128xbf16>, vector<128x128xf32> -> vector<128x128xf32>
    %5 = vector.extract_strided_slice %4 {offsets = [0, 0], sizes = [64, 128], strides = [1, 1]} : vector<128x128xf32> to vector<64x128xf32>
    %6 = vector.extract_strided_slice %4 {offsets = [64, 0], sizes = [64, 128], strides = [1, 1]} : vector<128x128xf32> to vector<64x128xf32>
    %7 = arith.index_cast %1 : i32 to index
    %c0_3 = arith.constant 0 : index
    %8 = vector.load %arg2[%7, %c0_3] : memref<64x128xbf16, #tpu.memory_space<vmem>>, vector<64x128xbf16>
    %9 = vector.extract_strided_slice %8 {offsets = [0, 0], sizes = [64, 64], strides = [1, 1]} : vector<64x128xbf16> to vector<64x64xbf16>
    %10 = arith.extf %9 : vector<64x64xbf16> to vector<64x64xf32>
    %11 = vector.extract_strided_slice %8 {offsets = [0, 64], sizes = [64, 64], strides = [1, 1]} : vector<64x128xbf16> to vector<64x64xbf16>
    %12 = arith.extf %11 : vector<64x64xbf16> to vector<64x64xf32>
    %13 = vector.extract_strided_slice %5 {offsets = [0, 64], sizes = [64, 64], strides = [1, 1]} : vector<64x128xf32> to vector<64x64xf32>
    %14 = vector.extract_strided_slice %5 {offsets = [0, 0], sizes = [64, 64], strides = [1, 1]} : vector<64x128xf32> to vector<64x64xf32>
    %15 = arith.mulf %12, %14 : vector<64x64xf32>
    %16 = vector.extract_strided_slice %6 {offsets = [0, 0], sizes = [64, 64], strides = [1, 1]} : vector<64x128xf32> to vector<64x64xf32>
    %17 = vector.extract_strided_slice %6 {offsets = [0, 64], sizes = [64, 64], strides = [1, 1]} : vector<64x128xf32> to vector<64x64xf32>
    %18 = arith.mulf %10, %17 : vector<64x64xf32>
    %19 = tpu.concatenate %13, %15, %16, %18 in 1 : vector<64x64xf32>, vector<64x64xf32>, vector<64x64xf32>, vector<64x64xf32> -> vector<64x256xf32>
    %20 = arith.truncf %19 : vector<64x256xf32> to vector<64x256xbf16>
    %c0_4 = arith.constant 0 : index
    %c0_5 = arith.constant 0 : index
    %21 = vector.load %arg3[%c0_4, %c0_5] : memref<256x128xbf16, #tpu.memory_space<vmem>>, vector<256x128xbf16>
    %cst_6 = arith.constant dense<0.000000e+00> : vector<64x128xf32>
    %22 = tpu.matmul %20, %21, %cst_6 {dimension_numbers = #tpu.dot_dimension_numbers<[1], [0], [0], [1], [0, 0, 1, 1], [], []>} : vector<64x256xbf16>, vector<256x128xbf16>, vector<64x128xf32> -> vector<64x128xf32>
    %23 = arith.extf %8 : vector<64x128xbf16> to vector<64x128xf32>
    %24 = arith.addf %22, %23 : vector<64x128xf32>
    %cst_7 = arith.constant 0.000000e+00 : f32
    %25 = vector.broadcast %cst_7 : f32 to vector<64x128xf32>
    %26 = arith.cmpf oge, %24, %25 : vector<64x128xf32>
    %cst_8 = arith.constant 2.000000e-01 : f32
    %27 = vector.broadcast %cst_8 : f32 to vector<64x128xf32>
    %28 = arith.mulf %27, %24 : vector<64x128xf32>
    %29 = arith.select %26, %24, %28 : vector<64x128xi1>, vector<64x128xf32>
    %30 = arith.truncf %29 : vector<64x128xf32> to vector<64x128xbf16>
    %c0_9 = arith.constant 0 : index
    %c0_10 = arith.constant 0 : index
    %31 = vector.load %arg4[%c0_9, %c0_10] : memref<64x128xbf16, #tpu.memory_space<vmem>>, vector<64x128xbf16>
    tpu.vector_store %arg4[%c0_9, %c0_10], %30 {strides = array<i32>} : memref<64x128xbf16, #tpu.memory_space<vmem>>, vector<64x128xbf16>,
    return
  }
  func.func @transform_0(%arg0: i32) -> (i32, i32) {
    %c0_i32 = arith.constant 0 : i32
    %c0_i32_0 = arith.constant 0 : i32
    return %arg0, %c0_i32 : i32, i32
  }
  func.func @transform_1(%arg0: i32) -> (i32, i32) {
    %c0_i32 = arith.constant 0 : i32
    %c0_i32_0 = arith.constant 0 : i32
    %c0_i32_1 = arith.constant 0 : i32
    return %c0_i32, %c0_i32_0 : i32, i32
  }
  func.func @transform_2(%arg0: i32) -> (i32, i32) {
    %c0_i32 = arith.constant 0 : i32
    %c0_i32_0 = arith.constant 0 : i32
    %c0_i32_1 = arith.constant 0 : i32
    return %c0_i32, %c0_i32_0 : i32, i32
  }
  func.func @transform_3(%arg0: i32) -> (i32, i32) {
    %c0_i32 = arith.constant 0 : i32
    %c0_i32_0 = arith.constant 0 : i32
    return %arg0, %c0_i32 : i32, i32
  }
}

</mosaic_0001>

<bundles_post_ra>
// kernel: tpu_custom_call.1
= control target key start
LH: loop header
LB: loop body
LE: loop exit
PB: predicated region body
PF: predicated region fallthrough
CT: control target
= control target key end

     0   :  { %8 = vsyncpa [#allocation3], 0  ;;  %s1189_s0 = inlined_call_operand.vmem [shape: bf16[128,64], index: 0, kind: input, shape index: {}]   ;;  %s1190_s1 = inlined_call_operand.vmem [shape: bf16[64,128], index: 1, kind: input, shape index: {}]   ;;  %s1191_s2 = inlined_call_operand.hbm [shape: bf16[256,128], index: 2, kind: input, shape index: {}]   ;;  %s1192_s3 = inlined_call_operand.hbm [shape: bf16[64,128], index: 3, kind: output, shape index: {}]  }
   0x1   :  { %9 = vsyncpa [#allocation4], 0  ;;  %s959_s12 = smov [#allocation2]   ;;  %s911_s16 = scalar_lea.hbm %s1191_s2, 2048 }
   0x2   :  { %s19_s13 = sshll.u32 %s959_s12, 4  ;;  %p912_p0 = scmp.ne.s32.totalorder %s1191_s2, %s911_s16  ;;  %s20_s13 = int_to_ptr.vmem [resolvable:$true] %s19_s13 }
   0x3   :  { %p915_p1 = scmp.lt.u32.totalorder %s911_s16, %s1191_s2 }
   0x5   :  { %p917_p2 = pnand %p915_p1, %p912_p0 }
   0x7   :  { %920 = shalt.err (!%p917_p2)
}
   0x8   :  { %s921_s21 = scalar_lea.vmem %s20_s13, 2048  ;;  %p926_p4 = scmp.lt.s32.totalorder %s20_s13, %s20_s13 }
   0x9   :  { %p922_p3 = scmp.ne.s32.totalorder %s20_s13, %s921_s21  ;;  %p927_p5 = scmp.lt.s32.totalorder %s921_s21, %s921_s21 }
   0xb   :  { %p928_p6 = por %p927_p5, %p926_p4 }
   0xd   :  { %p929_p7 = pnand %p928_p6, %p922_p3 }
   0xf   :  { %932 = shalt.err (!%p929_p7)
}
  0x10   :  { %s960_s22 = smov 64   ;;  %s961_s23 = smov 4  }
  0x11   :  { %25 = dma.hbm_to_vmem [thread:$0]  %s1191_s2, 2048, %s20_s13, [#allocation3], %s960_s22, %s960_s22, %s961_s23  }
  0x12   :  { %955 = dma.done.wait [#allocation3], 2048  }
  0x13   :  { %956 = vsyncadd [#allocation3], 4294965248  ;;  %v883_v0 = vld [vmem:[%s1190_s1] sm:$0xff]   ;;  %v884_v1 = vld [vmem:[%s1190_s1 + $0x8] sm:$0xff]   ;;  %vm119_vm0 = vcmask 523264  }
  0x14   :  { %819 = vmatprep.subr.bf16.mxu0 %v883_v0  ;;  %v885_v2 = vld [vmem:[%s1190_s1 + $0x10] sm:$0xff]   ;;  %v887_v3 = vld [vmem:[%s1189_s0] sm:$0xff]   ;;  %v886_v4 = vld [vmem:[%s1190_s1 + $0x18] sm:$0xff]  }
  0x15   :  { %820 = vmatpush3.bf16.msra.mxu0 %v883_v0  ;;  %827 = vmatprep.mubr.msk.bf16.mxu0 %vm119_vm0, %v887_v3  ;;  %v888_v5 = vld [vmem:[%s1189_s0 + $0x8] sm:$0xff]   ;;  %v889_v6 = vld [vmem:[%s1189_s0 + $0x10] sm:$0xff]   ;;  %v890_v7 = vld [vmem:[%s1189_s0 + $0x18] sm:$0xff]  }
  0x16   :  { %821 = vmatprep.subr.bf16.mxu0 %v884_v1  ;;  %v891_v8 = vld [vmem:[%s1189_s0 + $0x20] sm:$0xff]   ;;  %v892_v9 = vld [vmem:[%s1189_s0 + $0x28] sm:$0xff]   ;;  %v893_v10 = vld [vmem:[%s1189_s0 + $0x30] sm:$0xff]  }
  0x17   :  { %v894_v11 = vld [vmem:[%s1189_s0 + $0x38] sm:$0xff]   ;;  %v895_v28 = vld [vmem:[#allocation2 + $0x40] sm:$0xff]   ;;  %v897_v30 = vld [vmem:[#allocation2 + $0x48] sm:$0xff]  }
  0x18   :  { %v896_v29 = vld [vmem:[#allocation2] sm:$0xff]   ;;  %843 = vmatprep.subr.bf16.mxu1 %v895_v28  ;;  %v898_v31 = vld [vmem:[#allocation2 + $0x8] sm:$0xff]   ;;  %v899_v32 = vld [vmem:[#allocation2 + $0x50] sm:$0xff]  }
  0x19   :  { %822 = vmatpush3.bf16.msra.mxu0 %v884_v1  ;;  %851 = vmatpush3.bf16.msra.mxu1 %v896_v29  ;;  %v900_v33 = vld [vmem:[#allocation2 + $0x10] sm:$0xff]   ;;  %v901_v34 = vld [vmem:[#allocation2 + $0x58] sm:$0xff]   ;;  %v903_v36 = vld [vmem:[#allocation2 + $0x60] sm:$0xff]  }
  0x1a   :  { %823 = vmatprep.subr.bf16.mxu0 %v885_v2  ;;  %844 = vmatprep.subr.bf16.mxu1 %v897_v30  ;;  %v902_v35 = vld [vmem:[#allocation2 + $0x18] sm:$0xff]   ;;  %v904_v37 = vld [vmem:[#allocation2 + $0x20] sm:$0xff]   ;;  %v905_v38 = vld [vmem:[#allocation2 + $0x68] sm:$0xff]  }
  0x1b   :  { %v906_v39 = vld [vmem:[#allocation2 + $0x28] sm:$0xff]   ;;  %v907_v40 = vld [vmem:[#allocation2 + $0x70] sm:$0xff]   ;;  %v909_v42 = vld [vmem:[#allocation2 + $0x78] sm:$0xff]  }
  0x1c   :  { %v908_v41 = vld [vmem:[#allocation2 + $0x30] sm:$0xff]   ;;  %v910_v43 = vld [vmem:[#allocation2 + $0x38] sm:$0xff]   ;;  %v761_v44 = vld [vmem:[%s1190_s1 + $0x8] sm:$0xff]  }
  0x1d   :  { %824 = vmatpush3.bf16.msra.mxu0 %v885_v2  ;;  %852 = vmatpush3.bf16.msra.mxu1 %v898_v31  ;;  %v1089_v46 = vunpack.c.l.bf16 %v761_v44  ;;  %v1091_v47 = vunpack.c.h.bf16 %v761_v44  ;;  %v762_v52 = vld [vmem:[%s1190_s1 + $0x10] sm:$0xff]   ;;  %v726_v58 = vld [vmem:[%s1190_s1] sm:$0xff]   ;;  %v763_v61 = vld [vmem:[%s1190_s1 + $0x18] sm:$0xff]   ;;  %s962_s1 = smov [#allocation5]  }
  0x1e   :  { %825 = vmatprep.subr.bf16.mxu0 %v886_v4  ;;  %845 = vmatprep.subr.bf16.mxu1 %v899_v32  ;;  %v1099_v54 = vunpack.c.l.bf16 %v762_v52  ;;  %v1101_v55 = vunpack.c.h.bf16 %v762_v52  ;;  %v1113_v62 = vunpack.c.h.bf16 %v726_v58  ;;  %v1115_v0 = vunpack.c.l.bf16 %v726_v58  ;;  %s659_s4 = sshll.u32 %s962_s1, 4  ;;  %s660_s4 = int_to_ptr.vmem [resolvable:$true] %s659_s4 }
  0x1f   :  { %v1119_v2 = vunpack.c.l.bf16 %v763_v61  ;;  %v1122_v3 = vunpack.c.h.bf16 %v763_v61  ;;  %s933_s5 = scalar_lea.vmem %s660_s4, 512  ;;  %p938_p9 = scmp.lt.s32.totalorder %s660_s4, %s660_s4 }
  0x20   :  { %p934_p8 = scmp.ne.s32.totalorder %s660_s4, %s933_s5  ;;  %p939_p10 = scmp.lt.s32.totalorder %s933_s5, %s933_s5 }
  0x21   :  { %826 = vmatpush3.bf16.msra.mxu0 %v886_v4  ;;  %853 = vmatpush3.bf16.msra.mxu1 %v900_v33 }
  0x22   :  { %779 = vmatprep.subr.bf16.mxu0 %v895_v28  ;;  %846 = vmatprep.subr.bf16.mxu1 %v901_v34  ;;  %p940_p11 = por %p939_p10, %p938_p9 }
  0x24   :  { %828 = vmatmul.mubr.msk.bf16.vlgmr.msra.gmra.mrb[0].mxu0 %vm119_vm0, %v888_v5  ;;  %p941_p12 = pnand %p940_p11, %p934_p8 }
  0x25   :  { %831 = vmatprep.mubr.msk.bf16.mxu0 %vm119_vm0, %v889_v6  ;;  %780 = vmatpush3.bf16.msra.mxu0 %v896_v29 }
  0x26   :  { %781 = vmatprep.subr.bf16.mxu0 %v897_v30  ;;  %854 = vmatpush3.bf16.msra.mxu1 %v902_v35 }
  0x27   :  { %847 = vmatprep.subr.bf16.mxu1 %v903_v36 }
  0x29   :  { %782 = vmatpush3.bf16.msra.mxu0 %v898_v31 }
  0x2a   :  { %783 = vmatprep.subr.bf16.mxu0 %v899_v32  ;;  %855 = vmatpush3.bf16.msra.mxu1 %v904_v37 }
  0x2b   :  { %848 = vmatprep.subr.bf16.mxu1 %v905_v38 }
  0x2c   :  { %832 = vmatmul.mubr.msk.bf16.gmra.mrb[4].mxu0 %vm119_vm0, %v890_v7 }
  0x2d   :  { %835 = vmatprep.mubr.msk.bf16.mxu0 %vm119_vm0, %v891_v8  ;;  %784 = vmatpush3.bf16.msra.mxu0 %v900_v33 }
  0x2e   :  { %785 = vmatprep.subr.bf16.mxu0 %v901_v34  ;;  %856 = vmatpush3.bf16.msra.mxu1 %v906_v39 }
  0x2f   :  { %849 = vmatprep.subr.bf16.mxu1 %v907_v40 }
  0x31   :  { %786 = vmatpush3.bf16.msra.mxu0 %v902_v35 }
  0x32   :  { %787 = vmatprep.subr.bf16.mxu0 %v903_v36  ;;  %857 = vmatpush3.bf16.msra.mxu1 %v908_v41 }
  0x33   :  { %850 = vmatprep.subr.bf16.mxu1 %v909_v42 }
  0x34   :  { %836 = vmatmul.mubr.msk.bf16.gmra.mrb[8].mxu0 %vm119_vm0, %v892_v9 }
  0x35   :  { %839 = vmatprep.mubr.msk.bf16.mxu0 %vm119_vm0, %v893_v10  ;;  %788 = vmatpush3.bf16.msra.mxu0 %v904_v37 }
  0x36   :  { %789 = vmatprep.subr.bf16.mxu0 %v905_v38  ;;  %858 = vmatpush3.bf16.msra.mxu1 %v910_v43 }
  0x39   :  { %790 = vmatpush3.bf16.msra.mxu0 %v906_v39 }
  0x3a   :  { %791 = vmatprep.subr.bf16.mxu0 %v907_v40 }
  0x3c   :  { %840 = vmatmul.mubr.msk.bf16.gmra.mrb[12].mxu0 %vm119_vm0, %v894_v11 }
  0x3d   :  { %792 = vmatpush3.bf16.msra.mxu0 %v908_v41 }
  0x3e   :  { %793 = vmatprep.subr.bf16.mxu0 %v909_v42 }
  0x41   :  { %794 = vmatpush3.bf16.msra.mxu0 %v910_v43 }
  0xf7   :  { %v829_v12 = vpop.f32.mrb[0].mxu0 }
  0xf8   :  { %v1042_v13 = vpop.f32.mrb[1].mxu0 }
  0xf9   :  { %v830_v14 = vpop.f32.mrb[2].mxu0 }
  0xfa   :  { %v181_v15 = vpop.f32.mrb[3].mxu0 }
  0xff   :  { %v1044_v16 = vpop.f32.mrb[4].mxu0 }
 0x100   :  { %v194_v17 = vpop.f32.mrb[5].mxu0 }
 0x101   :  { %v1046_v18 = vpop.f32.mrb[6].mxu0 }
 0x102   :  { %v1048_v19 = vpop.f32.mrb[7].mxu0 }
 0x107   :  { %v1050_v20 = vpop.f32.mrb[8].mxu0 }
 0x108   :  { %313 = vrot.lane.b32.xlu0 %v1050_v20, %s960_s22  ;;  %v1054_v21 = vpop.f32.mrb[9].mxu0 }
 0x109   :  { %v1056_v22 = vpop.f32.mrb[10].mxu0 }
 0x10a   :  { %v1058_v23 = vpop.f32.mrb[11].mxu0 }
 0x10c   :  { %315 = vrot.lane.b32.xlu0 %v1056_v22, %s960_s22 }
 0x10f   :  { %v1062_v24 = vpop.f32.mrb[12].mxu0 }
 0x110   :  { %309 = vrot.lane.b32.xlu0 %v1054_v21, %s960_s22  ;;  %v1066_v25 = vpop.f32.mrb[13].mxu0 }
 0x111   :  { %317 = vrot.lane.b32.xlu1 %v1066_v25, %s960_s22  ;;  %v1070_v26 = vpop.f32.mrb[14].mxu0 }
 0x112   :  { %v1072_v27 = vpop.f32.mrb[15].mxu0 }
 0x114   :  { %321 = vrot.lane.b32.xlu0 %v1062_v24, %s960_s22 }
 0x115   :  { %319 = vrot.lane.b32.xlu1 %v1072_v27, %s960_s22 }
 0x118   :  { %273 = vrot.lane.b32.xlu0 %v829_v12, %s960_s22 }
 0x119   :  { %311 = vrot.lane.b32.xlu1 %v1058_v23, %s960_s22 }
 0x11d   :  { %323 = vrot.lane.b32.xlu1 %v1070_v26, %s960_s22 }
 0x121   :  { %275 = vrot.lane.b32.xlu1 %v830_v14, %s960_s22 }
 0x125   :  { %277 = vrot.lane.b32.xlu1 %v194_v17, %s960_s22 }
 0x129   :  { %271 = vrot.lane.b32.xlu1 %v181_v15, %s960_s22 }
 0x17a   :  { %v314_v45 = vpop.permute.xlu0 %313 }
 0x17b   :  { %v335_v49 = vmul.f32 %v1089_v46, %v314_v45 }
 0x17e   :  { %v316_v48 = vpop.permute.xlu0 %315 }
 0x17f   :  { %v336_v50 = vmul.f32 %v1091_v47, %v316_v48 }
 0x181   :  { %v863_v51 = vpack.i.bf16 %v336_v50, %v335_v49 }
 0x182   :  { %v310_v56 = vpop.permute.xlu0 %309 }
 0x183   :  { %864 = vrot.lane.b32.xlu0 %v863_v51, %s960_s22  ;;  %v318_v53 = vpop.permute.xlu1 %317  ;;  %v333_v6 = vmul.f32 %v1115_v0, %v310_v56 }
 0x184   :  { %v337_v59 = vmul.f32 %v1099_v54, %v318_v53 }
 0x186   :  { %v322_v4 = vpop.permute.xlu0 %321 }
 0x187   :  { %279 = vrot.lane.b32.xlu0 %v1048_v19, %s960_s22  ;;  %v320_v57 = vpop.permute.xlu1 %319  ;;  %v339_v8 = vmul.f32 %v1119_v2, %v322_v4 }
 0x188   :  { %v338_v60 = vmul.f32 %v1101_v55, %v320_v57 }
 0x18a   :  { %v868_v63 = vpack.i.bf16 %v338_v60, %v337_v59 }
 0x18b   :  { %269 = vrot.lane.b32.xlu0 %v1042_v13, %s960_s22  ;;  %v312_v1 = vpop.permute.xlu1 %311  ;;  %v274_v13 = vpop.permute.xlu0 %273 }
 0x18c   :  { %869 = vrot.lane.b32.xlu1 %v868_v63, %s960_s22  ;;  %v334_v5 = vmul.f32 %v1113_v62, %v312_v1 }
 0x18e   :  { %v873_v10 = vpack.i.bf16 %v334_v5, %v333_v6 }
 0x18f   :  { %281 = vrot.lane.b32.xlu0 %v1044_v16, %s960_s22  ;;  %v324_v7 = vpop.permute.xlu1 %323  ;;  %v295_v16 = vmul.f32 %v1089_v46, %v274_v13 }
 0x190   :  { %v340_v9 = vmul.f32 %v1122_v3, %v324_v7  ;;  %283 = vrot.lane.b32.xlu1 %v1046_v18, %s960_s22 }
 0x191   :  { %v375_v31 = vsel %vm119_vm0, %v274_v13, %v295_v16 }
 0x192   :  { %v878_v11 = vpack.i.bf16 %v340_v9, %v339_v8 }
 0x193   :  { %874 = vrot.lane.b32.xlu0 %v873_v10, %s960_s22  ;;  %v276_v12 = vpop.permute.xlu1 %275 }
 0x194   :  { %879 = vrot.lane.b32.xlu1 %v878_v11, %s960_s22  ;;  %v296_v14 = vmul.f32 %v1091_v47, %v276_v12 }
 0x196   :  { %v376_v29 = vsel %vm119_vm0, %v276_v12, %v296_v14 }
 0x197   :  { %v278_v15 = vpop.permute.xlu1 %277  ;;  %v391_v34 = vpack.c.bf16 %v376_v29, %v375_v31 }
 0x198   :  { %v297_v38 = vmul.f32 %v1099_v54, %v278_v15 }
 0x19a   :  { %v377_v44 = vsel %vm119_vm0, %v278_v15, %v297_v38 }
 0x19b   :  { %v272_v35 = vpop.permute.xlu1 %271 }
 0x19c   :  { %v294_v53 = vmul.f32 %v1113_v62, %v272_v35 }
 0x19e   :  { %v374_v5 = vsel %vm119_vm0, %v272_v35, %v294_v53 }
 0x1f5   :  { %v865_v17 = vpop.permute.xlu0 %864 }
 0x1f6   :  { %v867_v19 = vunpack.i.h.bf16 %v865_v17  ;;  %v866_v28 = vunpack.i.l.bf16 %v865_v17 }
 0x1f8   :  { %v383_v18 = vsel %vm119_vm0, %v1050_v20, %v866_v28  ;;  %v384_v30 = vsel %vm119_vm0, %v1056_v22, %v867_v19 }
 0x1f9   :  { %v280_v32 = vpop.permute.xlu0 %279  ;;  %v392_v33 = vpack.c.bf16 %v384_v30, %v383_v18 }
 0x1fa   :  { %v298_v36 = vmul.f32 %v1101_v55, %v280_v32 }
 0x1fb   :  { %565 = vmatprep.mubr.bf16.mxu1 %v392_v33 }
 0x1fc   :  { %566 = vmatmul.mubr.bf16.vlgmr.msra.gmra.mrb[0].mxu1 %v391_v34  ;;  %v378_v20 = vsel %vm119_vm0, %v280_v32, %v298_v36 }
 0x1fd   :  { %v270_v37 = vpop.permute.xlu0 %269  ;;  %v393_v49 = vpack.c.bf16 %v378_v20, %v377_v44 }
 0x1fe   :  { %v870_v39 = vpop.permute.xlu1 %869  ;;  %v293_v50 = vmul.f32 %v1115_v0, %v270_v37 }
 0x1ff   :  { %v872_v40 = vunpack.i.h.bf16 %v870_v39  ;;  %v871_v41 = vunpack.i.l.bf16 %v870_v39 }
 0x201   :  { %v282_v42 = vpop.permute.xlu0 %281  ;;  %v385_v22 = vsel %vm119_vm0, %v1066_v25, %v871_v41  ;;  %v386_v43 = vsel %vm119_vm0, %v1072_v27, %v872_v40  ;;  %v373_v27 = vsel %vm119_vm0, %v270_v37, %v293_v50 }
 0x202   :  { %v284_v45 = vpop.permute.xlu1 %283  ;;  %v394_v48 = vpack.c.bf16 %v386_v43, %v385_v22  ;;  %v299_v51 = vmul.f32 %v1119_v2, %v282_v42  ;;  %v389_v9 = vpack.c.bf16 %v374_v5, %v373_v27 }
 0x203   :  { %v300_v52 = vmul.f32 %v1122_v3, %v284_v45 }
 0x204   :  { %573 = vmatprep.mubr.bf16.mxu1 %v394_v48  ;;  %v379_v61 = vsel %vm119_vm0, %v282_v42, %v299_v51 }
 0x205   :  { %v875_v56 = vpop.permute.xlu0 %874  ;;  %574 = vmatmul.mubr.bf16.gmra.mrb[4].mxu1 %v393_v49  ;;  %v380_v63 = vsel %vm119_vm0, %v284_v45, %v300_v52 }
 0x206   :  { %v877_v25 = vunpack.i.h.bf16 %v875_v56  ;;  %v876_v57 = vunpack.i.l.bf16 %v875_v56  ;;  %v880_v58 = vpop.permute.xlu1 %879  ;;  %v395_v11 = vpack.c.bf16 %v380_v63, %v379_v61 }
 0x207   :  { %v882_v59 = vunpack.i.h.bf16 %v880_v58  ;;  %v881_v60 = vunpack.i.l.bf16 %v880_v58 }
 0x208   :  { %v381_v1 = vsel %vm119_vm0, %v1054_v21, %v876_v57  ;;  %v382_v4 = vsel %vm119_vm0, %v1058_v23, %v877_v25 }
 0x209   :  { %v390_v6 = vpack.c.bf16 %v382_v4, %v381_v1  ;;  %v387_v7 = vsel %vm119_vm0, %v1062_v24, %v881_v60  ;;  %v388_v8 = vsel %vm119_vm0, %v1070_v26, %v882_v59 }
 0x20a   :  { %v396_v10 = vpack.c.bf16 %v388_v8, %v387_v7 }
 0x20b   :  { %557 = vmatprep.mubr.bf16.mxu0 %v390_v6 }
 0x20c   :  { %558 = vmatmul.mubr.bf16.vlgmr.msra.gmra.mrb[16].mxu0 %v389_v9  ;;  %581 = vmatprep.mubr.bf16.mxu1 %v396_v10 }
 0x20d   :  { %582 = vmatmul.mubr.bf16.gmra.mrb[8].mxu1 %v395_v11 }
 0x2cf   :  { %v801_v21 = vpop.f32.mrb[0].mxu1 }
 0x2d0   :  { %v802_v12 = vpop.f32.mrb[1].mxu1 }
 0x2d1   :  { %v803_v13 = vadd.f32 %v802_v12, %v801_v21  ;;  %v804_v23 = vpop.f32.mrb[2].mxu1 }
 0x2d2   :  { %v805_v14 = vpop.f32.mrb[3].mxu1 }
 0x2d3   :  { %v568_v15 = vadd.f32 %v803_v13, %v1089_v46  ;;  %v806_v16 = vadd.f32 %v805_v14, %v804_v23 }
 0x2d5   :  { %v600_v17 = vmul.f32 0.2, %v568_v15  ;;  %v571_v24 = vadd.f32 %v806_v16, %v1091_v47  ;;  %vm592_vm1 = vcmp.ge.f32.partialorder %v568_v15, 0.0 }
 0x2d7   :  { %vm593_vm2 = vcmp.ge.f32.partialorder %v571_v24, 0.0  ;;  %v601_v26 = vmul.f32 0.2, %v571_v24  ;;  %v608_v28 = vsel %vm592_vm1, %v568_v15, %v600_v17 }
 0x2d8   :  { %v807_v19 = vpop.f32.mrb[4].mxu1 }
 0x2d9   :  { %v609_v29 = vsel %vm593_vm2, %v571_v24, %v601_v26  ;;  %v808_v18 = vpop.f32.mrb[5].mxu1 }
 0x2da   :  { %v749_v30 = vpack.c.bf16 %v609_v29, %v608_v28  ;;  %v809_v31 = vadd.f32 %v808_v18, %v807_v19  ;;  %v810_v32 = vpop.f32.mrb[6].mxu1 }
 0x2db   :  { %v811_v33 = vpop.f32.mrb[7].mxu1 }
 0x2dc   :  { %764 = vst [vmem:[#allocation5 + $0x8] sm:$0xff] %v749_v30   ;;  %v576_v34 = vadd.f32 %v809_v31, %v1099_v54  ;;  %v812_v35 = vadd.f32 %v811_v33, %v810_v32 }
 0x2de   :  { %v602_v46 = vmul.f32 0.2, %v576_v34  ;;  %v579_v36 = vadd.f32 %v812_v35, %v1101_v55  ;;  %vm594_vm3 = vcmp.ge.f32.partialorder %v576_v34, 0.0 }
 0x2df   :  { %v795_v47 = vpop.f32.mrb[16].mxu0 }
 0x2e0   :  { %vm595_vm4 = vcmp.ge.f32.partialorder %v579_v36, 0.0  ;;  %v603_v37 = vmul.f32 0.2, %v579_v36  ;;  %v796_v38 = vpop.f32.mrb[17].mxu0  ;;  %v813_v39 = vpop.f32.mrb[8].mxu1  ;;  %v610_v42 = vsel %vm594_vm3, %v576_v34, %v602_v46 }
 0x2e1   :  { %v797_v40 = vadd.f32 %v796_v38, %v795_v47  ;;  %v798_v41 = vpop.f32.mrb[18].mxu0  ;;  %v814_v20 = vpop.f32.mrb[9].mxu1 }
 0x2e2   :  { %v611_v22 = vsel %vm595_vm4, %v579_v36, %v603_v37  ;;  %v815_v43 = vadd.f32 %v814_v20, %v813_v39  ;;  %v799_v44 = vpop.f32.mrb[19].mxu0  ;;  %v816_v45 = vpop.f32.mrb[10].mxu1 }
 0x2e3   :  { %v754_v48 = vpack.c.bf16 %v611_v22, %v610_v42  ;;  %v560_v54 = vadd.f32 %v797_v40, %v1115_v0  ;;  %v800_v49 = vadd.f32 %v799_v44, %v798_v41  ;;  %v817_v50 = vpop.f32.mrb[11].mxu1 }
 0x2e4   :  { %v584_v55 = vadd.f32 %v815_v43, %v1119_v2  ;;  %v818_v51 = vadd.f32 %v817_v50, %v816_v45 }
 0x2e5   :  { %765 = vst [vmem:[#allocation5 + $0x10] sm:$0xff] %v754_v48   ;;  %v598_v52 = vmul.f32 0.2, %v560_v54  ;;  %v563_v53 = vadd.f32 %v800_v49, %v1113_v62  ;;  %vm590_vm5 = vcmp.ge.f32.partialorder %v560_v54, 0.0 }
 0x2e6   :  { %v604_v56 = vmul.f32 0.2, %v584_v55  ;;  %v587_v25 = vadd.f32 %v818_v51, %v1122_v3  ;;  %vm596_vm6 = vcmp.ge.f32.partialorder %v584_v55, 0.0 }
 0x2e7   :  { %vm591_vm7 = vcmp.ge.f32.partialorder %v563_v53, 0.0  ;;  %v599_v57 = vmul.f32 0.2, %v563_v53  ;;  %v606_v0 = vsel %vm590_vm5, %v560_v54, %v598_v52 }
 0x2e8   :  { %vm597_vm8 = vcmp.ge.f32.partialorder %v587_v25, 0.0  ;;  %v605_v58 = vmul.f32 0.2, %v587_v25  ;;  %v612_v59 = vsel %vm596_vm6, %v584_v55, %v604_v56 }
 0x2e9   :  { %v607_v27 = vsel %vm591_vm7, %v563_v53, %v599_v57 }
 0x2ea   :  { %v744_v2 = vpack.c.bf16 %v607_v27, %v606_v0  ;;  %v613_v60 = vsel %vm597_vm8, %v587_v25, %v605_v58 }
 0x2eb   :  { %v759_v61 = vpack.c.bf16 %v613_v60, %v612_v59 }
 0x2ec   :  { %745 = vst [vmem:[#allocation5] sm:$0xff] %v744_v2  }
 0x2ed   :  { %766 = vst [vmem:[#allocation5 + $0x18] sm:$0xff] %v759_v61  }
 0x2ee   :  { %944 = shalt.err (!%p941_p12)
}
 0x2ef   :  { %s945_s7 = scalar_lea.hbm %s1192_s3, 512 }
 0x2f0   :  { %p946_p13 = scmp.ne.s32.totalorder %s1192_s3, %s945_s7  ;;  %p949_p0 = scmp.lt.u32.totalorder %s945_s7, %s1192_s3 }
 0x2f2   :  { %p951_p1 = pnand %p949_p0, %p946_p13 }
 0x2f4   :  { %954 = shalt.err (!%p951_p1)
}
 0x2f5   :  { %665 = dma.vmem_to_hbm [thread:$0]  %s660_s4, 512, %s1192_s3, [#allocation4], %s960_s22, %s960_s22, %s961_s23  }
 0x2f6   :  { %957 = dma.done.wait [#allocation4], 512  }
 0x2f7   :  { %958 = vsyncadd [#allocation4], 4294966784 }
 0x2f8   :  { %669 = vsyncpa [#allocation3], 1 }
 0x2f9   :  { %670 = vsyncpa [#allocation4], 1 }

</bundles_post_ra>
